<compile_context>
chip_gen: v6e
topology: v6e:2x2x1
jax: 0.10.0
libtpu: 0.0.40
codegen_flags: <defaults>
</compile_context>

<pallas_src>
import functools

import jax
import jax.numpy as jnp
from jax.experimental import pallas as pl
from jax.experimental.pallas import tpu as pltpu

# MLP hidden widths from the PyTorch module (fixed by __init__).
HIDDEN_DIMS = (32, 64, 128, 128, 64, 32)
_SUBLANE = 8


def _round_up(x: int, m: int) -> int:
    return ((x + m - 1) // m) * m


def _dqn_kernel(x_ref, *refs):
    """refs = (w0, b0, w1, b1, ..., w6, b6, out_ref).

    One grid step processes TILE_B rows of x through all 7 layers; all
    weights/biases are VMEM-resident across grid steps. Matmul operands are
    bf16 (MXU-native), accumulation / bias-add / ReLU are f32.
    """
    out_ref = refs[-1]
    param_refs = refs[:-1]
    num_layers = len(param_refs) // 2

    h = x_ref[...]  # bf16 input tile
    for layer in range(num_layers):
        w = param_refs[2 * layer][...]            # bf16 [in, out]
        b_row = param_refs[2 * layer + 1][0, :]   # f32 bias row, read once
        h_in = h if h.dtype == jnp.bfloat16 else h.astype(jnp.bfloat16)
        # bf16 MXU matmul with f32 accumulation, then f32 bias-add (+ ReLU).
        h = jnp.dot(h_in, w, preferred_element_type=jnp.float32) + b_row
        if layer < num_layers - 1:
            h = jnp.maximum(h, 0.0)
    out_ref[...] = h.astype(out_ref.dtype)


@functools.partial(jax.jit, static_argnames=("tile_b",))
def _dqn_forward_impl(x, params, tile_b):
    batch, in_dim = x.shape
    out_dim = params[-2].shape[1]

    # --- bf16 matmul operands: weights + x. Biases stay f32 (VPU bias-add).
    kernel_params = []
    for i, p in enumerate(params):
        kernel_params.append(p.astype(jnp.bfloat16) if i % 2 == 0 else p)
    x = x.astype(jnp.bfloat16)

    # --- Batch tile: multiple of 8 sublanes, capped at tile_b.
    tile = min(int(tile_b), _round_up(batch, _SUBLANE))
    tile = max(_SUBLANE, _round_up(tile, _SUBLANE))

    # --- Pad the batch to a multiple of the tile (zero rows; sliced off below).
    padded_batch = _round_up(batch, tile)
    if padded_batch != batch:
        x = jnp.pad(x, ((0, padded_batch - batch), (0, 0)))

    grid = (padded_batch // tile,)

    x_spec = pl.BlockSpec((tile, in_dim), lambda i: (i, 0))
    # Weights/biases: full-array blocks, constant index_map -> VMEM-resident.
    param_specs = [pl.BlockSpec(p.shape, lambda i: (0, 0)) for p in kernel_params]
    # Narrow output block: last dim equals the full array dim (legal), no pad.
    out_spec = pl.BlockSpec((tile, out_dim), lambda i: (i, 0))

    # Cost estimate: dominated by HBM traffic on x/out; matmul FLOPs are tiny.
    dims = (in_dim,) + HIDDEN_DIMS + (out_dim,)
    flops = 2 * padded_batch * sum(dims[i] * dims[i + 1] for i in range(len(dims) - 1))
    param_bytes = sum(p.size * p.dtype.itemsize for p in kernel_params)
    bytes_accessed = (
        padded_batch * in_dim * 2      # bf16 x read
        + padded_batch * out_dim * 4   # narrow f32 out write
        + param_bytes
    )
    cost = pl.CostEstimate(
        flops=flops, transcendentals=0, bytes_accessed=bytes_accessed
    )

    out = pl.pallas_call(
        _dqn_kernel,
        out_shape=jax.ShapeDtypeStruct((padded_batch, out_dim), jnp.float32),
        grid=grid,
        in_specs=[x_spec] + param_specs,
        out_specs=out_spec,
        compiler_params=pltpu.CompilerParams(
            dimension_semantics=("parallel",),
            vmem_limit_bytes=32 * 1024 * 1024,
        ),
        cost_estimate=cost,
    )(x, *kernel_params)

    if padded_batch != batch:
        out = out[:batch]
    return out


def dqn_forward(x, params, tile_b=4096):
    """params: flat list [w0, b0, ..., w6, b6]; weights [in, out], biases [1, out]."""
    return _dqn_forward_impl(x, tuple(params), tile_b)


def init_dqn_params(key, in_dim, out_dim):
    """Deterministic init matching PyTorch Linear default:
    weight, bias ~ U(-1/sqrt(fan_in), 1/sqrt(fan_in)).
    Weights stored as [in_features, out_features]; biases as [1, out_features]."""
    dims = (in_dim,) + HIDDEN_DIMS + (out_dim,)
    params = []
    for i in range(len(dims) - 1):
        fan_in, fan_out = dims[i], dims[i + 1]
        key, kw, kb = jax.random.split(key, 3)
        bound = 1.0 / jnp.sqrt(jnp.float32(fan_in))
        w = jax.random.uniform(kw, (fan_in, fan_out), jnp.float32, -bound, bound)
        b = jax.random.uniform(kb, (1, fan_out), jnp.float32, -bound, bound)
        params.append(w)
        params.append(b)
    return params


def dqn_reference_f32(x, params):
    """Pure-JAX f32 reference (matches the PyTorch module numerics)."""
    h = x
    n = len(params) // 2
    for i in range(n):
        h = h @ params[2 * i] + params[2 * i + 1][0]
        if i < n - 1:
            h = jnp.maximum(h, 0.0)
    return h


def dqn_reference_bf16(x, params):
    """Pure-JAX reference that mirrors the kernel's bf16-operand / f32-accum math."""
    h = x.astype(jnp.bfloat16)
    n = len(params) // 2
    for i in range(n):
        w = params[2 * i].astype(jnp.bfloat16)
        b = params[2 * i + 1][0]
        h = jnp.dot(h.astype(jnp.bfloat16), w, preferred_element_type=jnp.float32) + b
        if i < n - 1:
            h = jnp.maximum(h, 0.0)
    return h


if __name__ == "__main__":
    key = jax.random.PRNGKey(0)
    in_dim, out_dim = 16, 4

    # Small shape consistent with the module spec.
    batch = 2
    key, kx = jax.random.split(key)
    x = jax.random.normal(kx, (batch, in_dim), jnp.float32)
    params = init_dqn_params(key, in_dim, out_dim)

    out = dqn_forward(x, params)
    out = jax.block_until_ready(out)
    ref_bf16 = dqn_reference_bf16(x, params)
    ref_f32 = dqn_reference_f32(x, params)
    assert out.shape == (batch, out_dim)
    # Tight check vs a reference that mirrors the kernel's bf16-operand math.
    assert jnp.allclose(out, ref_bf16, atol=1e-3, rtol=1e-3), "mismatch vs bf16 ref (small)"
    # Loose sanity check vs full-f32 numerics (intentional bf16-operand precision).
    assert jnp.allclose(out, ref_f32, atol=1e-1, rtol=1e-1), "mismatch vs f32 ref (small)"

    # Exercise the batch-tiled / padded path (multiple grid steps + ragged tail).
    key, kx2 = jax.random.split(key)
    x_big = jax.random.normal(kx2, (300, in_dim), jnp.float32)
    out_big = jax.block_until_ready(dqn_forward(x_big, params, tile_b=128))
    ref_big = dqn_reference_bf16(x_big, params)
    assert out_big.shape == (300, out_dim)
    assert jnp.allclose(out_big, ref_big, atol=1e-3, rtol=1e-3), "mismatch vs bf16 ref (tiled)"

    print("KERNEL_OK")
</pallas_src>

<mosaic_0001>
module attributes {stable_mosaic.version = 11 : i64} {
  func.func @_dqn_kernel(%arg0: i32, %arg1: memref<8x16xbf16, #tpu.memory_space<vmem>>, %arg2: memref<16x32xbf16, #tpu.memory_space<vmem>>, %arg3: memref<1x32xf32, #tpu.memory_space<vmem>>, %arg4: memref<32x64xbf16, #tpu.memory_space<vmem>>, %arg5: memref<1x64xf32, #tpu.memory_space<vmem>>, %arg6: memref<64x128xbf16, #tpu.memory_space<vmem>>, %arg7: memref<1x128xf32, #tpu.memory_space<vmem>>, %arg8: memref<128x128xbf16, #tpu.memory_space<vmem>>, %arg9: memref<1x128xf32, #tpu.memory_space<vmem>>, %arg10: memref<128x64xbf16, #tpu.memory_space<vmem>>, %arg11: memref<1x64xf32, #tpu.memory_space<vmem>>, %arg12: memref<64x32xbf16, #tpu.memory_space<vmem>>, %arg13: memref<1x32xf32, #tpu.memory_space<vmem>>, %arg14: memref<32x4xbf16, #tpu.memory_space<vmem>>, %arg15: memref<1x4xf32, #tpu.memory_space<vmem>>, %arg16: memref<8x4xf32, #tpu.memory_space<vmem>>) attributes {dimension_semantics = [#tpu.dimension_semantics<parallel>], iteration_bounds = array<i64: 1>, scalar_prefetch = 0 : i64, scratch_operands = 0 : i64, tpu.core_type = #tpu.core_type<tc>, window_params = [{transform_indices = @transform_0, window_bounds = array<i64: 8, 16>}, {pipeline_mode = #tpu.pipeline_mode<synchronous>, transform_indices = @transform_1, window_bounds = array<i64: 16, 32>}, {pipeline_mode = #tpu.pipeline_mode<synchronous>, transform_indices = @transform_2, window_bounds = array<i64: 1, 32>}, {pipeline_mode = #tpu.pipeline_mode<synchronous>, transform_indices = @transform_3, window_bounds = array<i64: 32, 64>}, {pipeline_mode = #tpu.pipeline_mode<synchronous>, transform_indices = @transform_4, window_bounds = array<i64: 1, 64>}, {pipeline_mode = #tpu.pipeline_mode<synchronous>, transform_indices = @transform_5, window_bounds = array<i64: 64, 128>}, {pipeline_mode = #tpu.pipeline_mode<synchronous>, transform_indices = @transform_6, window_bounds = array<i64: 1, 128>}, {pipeline_mode = #tpu.pipeline_mode<synchronous>, transform_indices = @transform_7, window_bounds = array<i64: 128, 128>}, {pipeline_mode = #tpu.pipeline_mode<synchronous>, transform_indices = @transform_8, window_bounds = array<i64: 1, 128>}, {pipeline_mode = #tpu.pipeline_mode<synchronous>, transform_indices = @transform_9, window_bounds = array<i64: 128, 64>}, {pipeline_mode = #tpu.pipeline_mode<synchronous>, transform_indices = @transform_10, window_bounds = array<i64: 1, 64>}, {pipeline_mode = #tpu.pipeline_mode<synchronous>, transform_indices = @transform_11, window_bounds = array<i64: 64, 32>}, {pipeline_mode = #tpu.pipeline_mode<synchronous>, transform_indices = @transform_12, window_bounds = array<i64: 1, 32>}, {pipeline_mode = #tpu.pipeline_mode<synchronous>, transform_indices = @transform_13, window_bounds = array<i64: 32, 4>}, {pipeline_mode = #tpu.pipeline_mode<synchronous>, transform_indices = @transform_14, window_bounds = array<i64: 1, 4>}, {transform_indices = @transform_15, window_bounds = array<i64: 8, 4>}]} {
    %c0 = arith.constant 0 : index
    %c0_0 = arith.constant 0 : index
    %0 = vector.load %arg1[%c0, %c0_0] : memref<8x16xbf16, #tpu.memory_space<vmem>>, vector<8x16xbf16>
    %c0_1 = arith.constant 0 : index
    %c0_2 = arith.constant 0 : index
    %1 = vector.load %arg2[%c0_1, %c0_2] : memref<16x32xbf16, #tpu.memory_space<vmem>>, vector<16x32xbf16>
    %c0_3 = arith.constant 0 : index
    %c0_4 = arith.constant 0 : index
    %2 = vector.load %arg3[%c0_3, %c0_4] : memref<1x32xf32, #tpu.memory_space<vmem>>, vector<1x32xf32>
    %3 = vector.shape_cast %2 : vector<1x32xf32> to vector<32xf32>
    %cst = arith.constant dense<0.000000e+00> : vector<8x32xf32>
    %4 = tpu.matmul %0, %1, %cst {dimension_numbers = #tpu.dot_dimension_numbers<[1], [0], [0], [1], [0, 0, 1, 1], [], []>} : vector<8x16xbf16>, vector<16x32xbf16>, vector<8x32xf32> -> vector<8x32xf32>
    %5 = vector.shape_cast %3 : vector<32xf32> to vector<1x32xf32>
    %6 = vector.broadcast %5 : vector<1x32xf32> to vector<8x32xf32>
    %7 = arith.addf %4, %6 : vector<8x32xf32>
    %cst_5 = arith.constant 0.000000e+00 : f32
    %8 = vector.broadcast %cst_5 : f32 to vector<8x32xf32>
    %9 = arith.maximumf %7, %8 : vector<8x32xf32>
    %c0_6 = arith.constant 0 : index
    %c0_7 = arith.constant 0 : index
    %10 = vector.load %arg4[%c0_6, %c0_7] : memref<32x64xbf16, #tpu.memory_space<vmem>>, vector<32x64xbf16>
    %c0_8 = arith.constant 0 : index
    %c0_9 = arith.constant 0 : index
    %11 = vector.load %arg5[%c0_8, %c0_9] : memref<1x64xf32, #tpu.memory_space<vmem>>, vector<1x64xf32>
    %12 = vector.shape_cast %11 : vector<1x64xf32> to vector<64xf32>
    %13 = arith.truncf %9 : vector<8x32xf32> to vector<8x32xbf16>
    %cst_10 = arith.constant dense<0.000000e+00> : vector<8x64xf32>
    %14 = tpu.matmul %13, %10, %cst_10 {dimension_numbers = #tpu.dot_dimension_numbers<[1], [0], [0], [1], [0, 0, 1, 1], [], []>} : vector<8x32xbf16>, vector<32x64xbf16>, vector<8x64xf32> -> vector<8x64xf32>
    %15 = vector.shape_cast %12 : vector<64xf32> to vector<1x64xf32>
    %16 = vector.broadcast %15 : vector<1x64xf32> to vector<8x64xf32>
    %17 = arith.addf %14, %16 : vector<8x64xf32>
    %cst_11 = arith.constant 0.000000e+00 : f32
    %18 = vector.broadcast %cst_11 : f32 to vector<8x64xf32>
    %19 = arith.maximumf %17, %18 : vector<8x64xf32>
    %c0_12 = arith.constant 0 : index
    %c0_13 = arith.constant 0 : index
    %20 = vector.load %arg6[%c0_12, %c0_13] : memref<64x128xbf16, #tpu.memory_space<vmem>>, vector<64x128xbf16>
    %c0_14 = arith.constant 0 : index
    %c0_15 = arith.constant 0 : index
    %21 = vector.load %arg7[%c0_14, %c0_15] : memref<1x128xf32, #tpu.memory_space<vmem>>, vector<1x128xf32>
    %22 = vector.shape_cast %21 : vector<1x128xf32> to vector<128xf32>
    %23 = arith.truncf %19 : vector<8x64xf32> to vector<8x64xbf16>
    %cst_16 = arith.constant dense<0.000000e+00> : vector<8x128xf32>
    %24 = tpu.matmul %23, %20, %cst_16 {dimension_numbers = #tpu.dot_dimension_numbers<[1], [0], [0], [1], [0, 0, 1, 1], [], []>} : vector<8x64xbf16>, vector<64x128xbf16>, vector<8x128xf32> -> vector<8x128xf32>
    %25 = vector.shape_cast %22 : vector<128xf32> to vector<1x128xf32>
    %26 = vector.broadcast %25 : vector<1x128xf32> to vector<8x128xf32>
    %27 = arith.addf %24, %26 : vector<8x128xf32>
    %cst_17 = arith.constant 0.000000e+00 : f32
    %28 = vector.broadcast %cst_17 : f32 to vector<8x128xf32>
    %29 = arith.maximumf %27, %28 : vector<8x128xf32>
    %c0_18 = arith.constant 0 : index
    %c0_19 = arith.constant 0 : index
    %30 = vector.load %arg8[%c0_18, %c0_19] : memref<128x128xbf16, #tpu.memory_space<vmem>>, vector<128x128xbf16>
    %c0_20 = arith.constant 0 : index
    %c0_21 = arith.constant 0 : index
    %31 = vector.load %arg9[%c0_20, %c0_21] : memref<1x128xf32, #tpu.memory_space<vmem>>, vector<1x128xf32>
    %32 = vector.shape_cast %31 : vector<1x128xf32> to vector<128xf32>
    %33 = arith.truncf %29 : vector<8x128xf32> to vector<8x128xbf16>
    %cst_22 = arith.constant dense<0.000000e+00> : vector<8x128xf32>
    %34 = tpu.matmul %33, %30, %cst_22 {dimension_numbers = #tpu.dot_dimension_numbers<[1], [0], [0], [1], [0, 0, 1, 1], [], []>} : vector<8x128xbf16>, vector<128x128xbf16>, vector<8x128xf32> -> vector<8x128xf32>
    %35 = vector.shape_cast %32 : vector<128xf32> to vector<1x128xf32>
    %36 = vector.broadcast %35 : vector<1x128xf32> to vector<8x128xf32>
    %37 = arith.addf %34, %36 : vector<8x128xf32>
    %cst_23 = arith.constant 0.000000e+00 : f32
    %38 = vector.broadcast %cst_23 : f32 to vector<8x128xf32>
    %39 = arith.maximumf %37, %38 : vector<8x128xf32>
    %c0_24 = arith.constant 0 : index
    %c0_25 = arith.constant 0 : index
    %40 = vector.load %arg10[%c0_24, %c0_25] : memref<128x64xbf16, #tpu.memory_space<vmem>>, vector<128x64xbf16>
    %c0_26 = arith.constant 0 : index
    %c0_27 = arith.constant 0 : index
    %41 = vector.load %arg11[%c0_26, %c0_27] : memref<1x64xf32, #tpu.memory_space<vmem>>, vector<1x64xf32>
    %42 = vector.shape_cast %41 : vector<1x64xf32> to vector<64xf32>
    %43 = arith.truncf %39 : vector<8x128xf32> to vector<8x128xbf16>
    %cst_28 = arith.constant dense<0.000000e+00> : vector<8x64xf32>
    %44 = tpu.matmul %43, %40, %cst_28 {dimension_numbers = #tpu.dot_dimension_numbers<[1], [0], [0], [1], [0, 0, 1, 1], [], []>} : vector<8x128xbf16>, vector<128x64xbf16>, vector<8x64xf32> -> vector<8x64xf32>
    %45 = vector.shape_cast %42 : vector<64xf32> to vector<1x64xf32>
    %46 = vector.broadcast %45 : vector<1x64xf32> to vector<8x64xf32>
    %47 = arith.addf %44, %46 : vector<8x64xf32>
    %cst_29 = arith.constant 0.000000e+00 : f32
    %48 = vector.broadcast %cst_29 : f32 to vector<8x64xf32>
    %49 = arith.maximumf %47, %48 : vector<8x64xf32>
    %c0_30 = arith.constant 0 : index
    %c0_31 = arith.constant 0 : index
    %50 = vector.load %arg12[%c0_30, %c0_31] : memref<64x32xbf16, #tpu.memory_space<vmem>>, vector<64x32xbf16>
    %c0_32 = arith.constant 0 : index
    %c0_33 = arith.constant 0 : index
    %51 = vector.load %arg13[%c0_32, %c0_33] : memref<1x32xf32, #tpu.memory_space<vmem>>, vector<1x32xf32>
    %52 = vector.shape_cast %51 : vector<1x32xf32> to vector<32xf32>
    %53 = arith.truncf %49 : vector<8x64xf32> to vector<8x64xbf16>
    %cst_34 = arith.constant dense<0.000000e+00> : vector<8x32xf32>
    %54 = tpu.matmul %53, %50, %cst_34 {dimension_numbers = #tpu.dot_dimension_numbers<[1], [0], [0], [1], [0, 0, 1, 1], [], []>} : vector<8x64xbf16>, vector<64x32xbf16>, vector<8x32xf32> -> vector<8x32xf32>
    %55 = vector.shape_cast %52 : vector<32xf32> to vector<1x32xf32>
    %56 = vector.broadcast %55 : vector<1x32xf32> to vector<8x32xf32>
    %57 = arith.addf %54, %56 : vector<8x32xf32>
    %cst_35 = arith.constant 0.000000e+00 : f32
    %58 = vector.broadcast %cst_35 : f32 to vector<8x32xf32>
    %59 = arith.maximumf %57, %58 : vector<8x32xf32>
    %c0_36 = arith.constant 0 : index
    %c0_37 = arith.constant 0 : index
    %60 = vector.load %arg14[%c0_36, %c0_37] : memref<32x4xbf16, #tpu.memory_space<vmem>>, vector<32x4xbf16>
    %c0_38 = arith.constant 0 : index
    %c0_39 = arith.constant 0 : index
    %61 = vector.load %arg15[%c0_38, %c0_39] : memref<1x4xf32, #tpu.memory_space<vmem>>, vector<1x4xf32>
    %62 = vector.shape_cast %61 : vector<1x4xf32> to vector<4xf32>
    %63 = arith.truncf %59 : vector<8x32xf32> to vector<8x32xbf16>
    %cst_40 = arith.constant dense<0.000000e+00> : vector<8x4xf32>
    %64 = tpu.matmul %63, %60, %cst_40 {dimension_numbers = #tpu.dot_dimension_numbers<[1], [0], [0], [1], [0, 0, 1, 1], [], []>} : vector<8x32xbf16>, vector<32x4xbf16>, vector<8x4xf32> -> vector<8x4xf32>
    %65 = vector.shape_cast %62 : vector<4xf32> to vector<1x4xf32>
    %66 = vector.broadcast %65 : vector<1x4xf32> to vector<8x4xf32>
    %67 = arith.addf %64, %66 : vector<8x4xf32>
    %c0_41 = arith.constant 0 : index
    %c0_42 = arith.constant 0 : index
    %68 = vector.load %arg16[%c0_41, %c0_42] : memref<8x4xf32, #tpu.memory_space<vmem>>, vector<8x4xf32>
    tpu.vector_store %arg16[%c0_41, %c0_42], %67 {strides = array<i32>} : memref<8x4xf32, #tpu.memory_space<vmem>>, vector<8x4xf32>,
    return
  }
  func.func @transform_0(%arg0: i32) -> (i32, i32) {
    %c0_i32 = arith.constant 0 : i32
    %c0_i32_0 = arith.constant 0 : i32
    return %arg0, %c0_i32 : i32, i32
  }
  func.func @transform_1(%arg0: i32) -> (i32, i32) {
    %c0_i32 = arith.constant 0 : i32
    %c0_i32_0 = arith.constant 0 : i32
    %c0_i32_1 = arith.constant 0 : i32
    return %c0_i32, %c0_i32_0 : i32, i32
  }
  func.func @transform_2(%arg0: i32) -> (i32, i32) {
    %c0_i32 = arith.constant 0 : i32
    %c0_i32_0 = arith.constant 0 : i32
    %c0_i32_1 = arith.constant 0 : i32
    return %c0_i32, %c0_i32_0 : i32, i32
  }
  func.func @transform_3(%arg0: i32) -> (i32, i32) {
    %c0_i32 = arith.constant 0 : i32
    %c0_i32_0 = arith.constant 0 : i32
    %c0_i32_1 = arith.constant 0 : i32
    return %c0_i32, %c0_i32_0 : i32, i32
  }
  func.func @transform_4(%arg0: i32) -> (i32, i32) {
    %c0_i32 = arith.constant 0 : i32
    %c0_i32_0 = arith.constant 0 : i32
    %c0_i32_1 = arith.constant 0 : i32
    return %c0_i32, %c0_i32_0 : i32, i32
  }
  func.func @transform_5(%arg0: i32) -> (i32, i32) {
    %c0_i32 = arith.constant 0 : i32
    %c0_i32_0 = arith.constant 0 : i32
    %c0_i32_1 = arith.constant 0 : i32
    return %c0_i32, %c0_i32_0 : i32, i32
  }
  func.func @transform_6(%arg0: i32) -> (i32, i32) {
    %c0_i32 = arith.constant 0 : i32
    %c0_i32_0 = arith.constant 0 : i32
    %c0_i32_1 = arith.constant 0 : i32
    return %c0_i32, %c0_i32_0 : i32, i32
  }
  func.func @transform_7(%arg0: i32) -> (i32, i32) {
    %c0_i32 = arith.constant 0 : i32
    %c0_i32_0 = arith.constant 0 : i32
    %c0_i32_1 = arith.constant 0 : i32
    return %c0_i32, %c0_i32_0 : i32, i32
  }
  func.func @transform_8(%arg0: i32) -> (i32, i32) {
    %c0_i32 = arith.constant 0 : i32
    %c0_i32_0 = arith.constant 0 : i32
    %c0_i32_1 = arith.constant 0 : i32
    return %c0_i32, %c0_i32_0 : i32, i32
  }
  func.func @transform_9(%arg0: i32) -> (i32, i32) {
    %c0_i32 = arith.constant 0 : i32
    %c0_i32_0 = arith.constant 0 : i32
    %c0_i32_1 = arith.constant 0 : i32
    return %c0_i32, %c0_i32_0 : i32, i32
  }
  func.func @transform_10(%arg0: i32) -> (i32, i32) {
    %c0_i32 = arith.constant 0 : i32
    %c0_i32_0 = arith.constant 0 : i32
    %c0_i32_1 = arith.constant 0 : i32
    return %c0_i32, %c0_i32_0 : i32, i32
  }
  func.func @transform_11(%arg0: i32) -> (i32, i32) {
    %c0_i32 = arith.constant 0 : i32
    %c0_i32_0 = arith.constant 0 : i32
    %c0_i32_1 = arith.constant 0 : i32
    return %c0_i32, %c0_i32_0 : i32, i32
  }
  func.func @transform_12(%arg0: i32) -> (i32, i32) {
    %c0_i32 = arith.constant 0 : i32
    %c0_i32_0 = arith.constant 0 : i32
    %c0_i32_1 = arith.constant 0 : i32
    return %c0_i32, %c0_i32_0 : i32, i32
  }
  func.func @transform_13(%arg0: i32) -> (i32, i32) {
    %c0_i32 = arith.constant 0 : i32
    %c0_i32_0 = arith.constant 0 : i32
    %c0_i32_1 = arith.constant 0 : i32
    return %c0_i32, %c0_i32_0 : i32, i32
  }
  func.func @transform_14(%arg0: i32) -> (i32, i32) {
    %c0_i32 = arith.constant 0 : i32
    %c0_i32_0 = arith.constant 0 : i32
    %c0_i32_1 = arith.constant 0 : i32
    return %c0_i32, %c0_i32_0 : i32, i32
  }
  func.func @transform_15(%arg0: i32) -> (i32, i32) {
    %c0_i32 = arith.constant 0 : i32
    %c0_i32_0 = arith.constant 0 : i32
    return %arg0, %c0_i32 : i32, i32
  }
}

</mosaic_0001>

<bundles_post_ra>
// kernel: _dqn_forward_impl.1
= control target key start
LH: loop header
LB: loop body
LE: loop exit
PB: predicated region body
PF: predicated region fallthrough
CT: control target
= control target key end

     0   :  { %v843_v0 = vmov 0.0   ;;  %vm844_vm0 = vmmov 0   ;;  %vm67_vm1 = vcmask 130048   ;;  %vm136_vm2 = vcmask 261120   ;;  %s1086_s1 = inlined_call_operand.vmem [shape: bf16[16,32], index: 1, kind: input, shape index: {}]   ;;  %s1087_s0 = inlined_call_operand.vmem [shape: bf16[8,16], index: 0, kind: input, shape index: {}]   ;;  %s1088_s3 = inlined_call_operand.vmem [shape: bf16[32,64], index: 3, kind: input, shape index: {}]   ;;  %s1089_s5 = inlined_call_operand.vmem [shape: bf16[64,128], index: 5, kind: input, shape index: {}]   ;;  %s1090_s2 = inlined_call_operand.vmem [shape: f32[1,32], index: 2, kind: input, shape index: {}]   ;;  %s1091_s7 = inlined_call_operand.vmem [shape: bf16[128,128], index: 7, kind: input, shape index: {}]   ;;  %s1092_s4 = inlined_call_operand.vmem [shape: f32[1,64], index: 4, kind: input, shape index: {}]   ;;  %s1093_s9 = inlined_call_operand.vmem [shape: bf16[128,64], index: 9, kind: input, shape index: {}]   ;;  %s1094_s6 = inlined_call_operand.vmem [shape: f32[1,128], index: 6, kind: input, shape index: {}]   ;;  %s1095_s11 = inlined_call_operand.vmem [shape: bf16[64,32], index: 11, kind: input, shape index: {}]   ;;  %s1096_s8 = inlined_call_operand.vmem [shape: f32[1,128], index: 8, kind: input, shape index: {}]   ;;  %s1097_s13 = inlined_call_operand.vmem [shape: bf16[32,4], index: 13, kind: input, shape index: {}]   ;;  %s1098_s10 = inlined_call_operand.vmem [shape: f32[1,64], index: 10, kind: input, shape index: {}]   ;;  %s1099_s12 = inlined_call_operand.vmem [shape: f32[1,32], index: 12, kind: input, shape index: {}]   ;;  %s1100_s14 = inlined_call_operand.vmem [shape: f32[1,4], index: 14, kind: input, shape index: {}]   ;;  %s1101_s15 = inlined_call_operand.vmem [shape: f32[8,4], index: 15, kind: output, shape index: {}]  }
   0x1   :  { %726 = vmatprep.subr.bf16.mxu0 %v843_v0  ;;  %v814_v1 = vld [vmem:[%s1086_s1] sm:$0xff]   ;;  %728 = vmatprep.mubr.msk.bf16.mxu0 %vm844_vm0, %v843_v0  ;;  %v815_v3 = vld [vmem:[%s1088_s3 + $0x8] sm:$0xff]   ;;  %v817_v5 = vld [vmem:[%s1089_s5 + $0x18] sm:$0xff]   ;;  %vm221_vm3 = vcmask 523264   ;;  %vm643_vm4 = vcmask 31744  }
   0x2   :  { %732 = vmatprep.subr.bf16.mxu1 %v843_v0  ;;  %736 = vmatprep.mubr.msk.bf16.mxu1 %vm844_vm0, %v843_v0  ;;  %v51_v2 = vld [vmem:[%s1087_s0] sm:$0xf]  ;;  %v818_v6 = vld [vmem:[%s1089_s5 + $0x10] sm:$0xff]   ;;  %v819_v15 = vld [vmem:[%s1089_s5 + $0x8] sm:$0xff]  }
   0x3   :  { %727 = vmatpush3.bf16.msra.mxu0 %v814_v1  ;;  %733 = vmatpush3.bf16.msra.mxu1 %v815_v3  ;;  %v816_v4 = vld [vmem:[%s1088_s3] sm:$0xff]   ;;  %v821_v17 = vld [vmem:[%s1091_s7 + $0x38] sm:$0xff]   ;;  %v822_v18 = vld [vmem:[%s1091_s7 + $0x30] sm:$0xff]  }
   0x4   :  { %740 = vmatprep.subr.bf16.mxu0 %v843_v0  ;;  %734 = vmatprep.subr.bf16.mxu1 %v843_v0  ;;  %v649_v7 = vld [vmem:[%s1090_s2] ss:$0 sm:$0xff]  ;;  %v823_v19 = vld [vmem:[%s1091_s7 + $0x28] sm:$0xff]   ;;  %v825_v21 = vld [vmem:[%s1091_s7 + $0x18] sm:$0xff]  }
   0x5   :  { %v820_v16 = vld [vmem:[%s1089_s5] sm:$0xff]   ;;  %v826_v22 = vld [vmem:[%s1091_s7 + $0x10] sm:$0xff]   ;;  %v827_v31 = vld [vmem:[%s1091_s7 + $0x8] sm:$0xff]  }
   0x6   :  { %729 = vmatmul.mubr.msk.bf16.vlgmr.msra.gmra.mxu0 %vm67_vm1, %v51_v2  ;;  %v824_v20 = vld [vmem:[%s1091_s7 + $0x20] sm:$0xff]   ;;  %v829_v33 = vld [vmem:[%s1093_s9 + $0x38] sm:$0xff]   ;;  %v830_v34 = vld [vmem:[%s1093_s9 + $0x30] sm:$0xff]  }
   0x7   :  { %748 = vmatprep.mubr.msk.bf16.mxu0 %vm844_vm0, %v843_v0  ;;  %735 = vmatpush3.bf16.msra.mxu1 %v816_v4  ;;  %v652_v23 = vld [vmem:[%s1092_s4] ss:$0 sm:$0xff]  ;;  %v831_v35 = vld [vmem:[%s1093_s9 + $0x28] sm:$0xff]   ;;  %v833_v37 = vld [vmem:[%s1093_s9 + $0x18] sm:$0xff]  }
   0x8   :  { %752 = vmatprep.subr.bf16.mxu1 %v843_v0  ;;  %741 = vmatpush3.bf16.msra.mxu0 %v817_v5  ;;  %v828_v32 = vld [vmem:[%s1091_s7] sm:$0xff]   ;;  %v834_v38 = vld [vmem:[%s1093_s9 + $0x10] sm:$0xff]   ;;  %v835_v47 = vld [vmem:[%s1093_s9 + $0x8] sm:$0xff]  }
   0x9   :  { %742 = vmatprep.subr.bf16.mxu0 %v843_v0  ;;  %v832_v36 = vld [vmem:[%s1093_s9 + $0x20] sm:$0xff]   ;;  %v837_v49 = vld [vmem:[%s1095_s11 + $0x18] sm:$0xff]   ;;  %v838_v50 = vld [vmem:[%s1095_s11 + $0x10] sm:$0xff]  }
   0xa   :  { %v656_v39 = vld [vmem:[%s1094_s6] ss:$0 sm:$0xff]  ;;  %v839_v59 = vld [vmem:[%s1095_s11 + $0x8] sm:$0xff]  }
   0xb   :  { %v836_v48 = vld [vmem:[%s1093_s9] sm:$0xff]   ;;  %v841_v61 = vld [vmem:[%s1097_s13 + $0x8] sm:$0xff]  }
   0xc   :  { %743 = vmatpush3.bf16.msra.mxu0 %v818_v6  ;;  %v662_v51 = vld [vmem:[%s1096_s8] ss:$0 sm:$0xff] }
   0xd   :  { %744 = vmatprep.subr.bf16.mxu0 %v843_v0  ;;  %v840_v60 = vld [vmem:[%s1095_s11] sm:$0xff]  }
   0xe   :  { %v671_v62 = vld [vmem:[%s1098_s10] ss:$0 sm:$0xff] }
  0x10   :  { %745 = vmatpush3.bf16.msra.mxu0 %v819_v15  ;;  %v686_v15 = vld [vmem:[%s1100_s14] ss:$0 sm:$0xff] }
  0x11   :  { %746 = vmatprep.subr.bf16.mxu0 %v843_v0 }
  0x14   :  { %747 = vmatpush3.bf16.msra.mxu0 %v820_v16 }
  0x15   :  { %772 = vmatprep.subr.bf16.mxu0 %v843_v0 }
  0xc6   :  { %v105_v8 = vpop.f32.mrf.mxu0 }
  0xc7   :  { %v106_v9 = vadd.f32 %v649_v7, %v105_v8  ;;  %v842_v7 = vld [vmem:[%s1097_s13] sm:$0xff]  }
  0xc8   :  { %v730_v10 = vpop.f32.mrf.mxu0 }
  0xc9   :  { %v111_v11 = vmax.f32 %v106_v9, 0.0 }
  0xca   :  { %v108_v12 = vpop.f32.mrf.mxu0 }
  0xcb   :  { %v117_v13 = vpack.c.bf16 %v111_v11, %v111_v11 }
  0xcc   :  { %v731_v14 = vpop.f32.mrf.mxu0 }
  0xcd   :  { %737 = vmatmul.mubr.msk.bf16.vlgmr.msra.gmra.mxu1 %vm136_vm2, %v117_v13 }
  0xce   :  { %768 = vmatprep.mubr.msk.bf16.mxu1 %vm844_vm0, %v843_v0  ;;  %753 = vmatpush3.bf16.msra.mxu1 %v821_v17 }
  0xcf   :  { %754 = vmatprep.subr.bf16.mxu1 %v843_v0 }
  0xd2   :  { %755 = vmatpush3.bf16.msra.mxu1 %v822_v18 }
  0xd3   :  { %756 = vmatprep.subr.bf16.mxu1 %v843_v0 }
  0xd6   :  { %757 = vmatpush3.bf16.msra.mxu1 %v823_v19 }
  0xd7   :  { %758 = vmatprep.subr.bf16.mxu1 %v843_v0 }
  0xda   :  { %759 = vmatpush3.bf16.msra.mxu1 %v824_v20 }
  0xdb   :  { %760 = vmatprep.subr.bf16.mxu1 %v843_v0 }
  0xde   :  { %761 = vmatpush3.bf16.msra.mxu1 %v825_v21 }
  0xdf   :  { %762 = vmatprep.subr.bf16.mxu1 %v843_v0 }
  0xe2   :  { %763 = vmatpush3.bf16.msra.mxu1 %v826_v22 }
  0xe3   :  { %764 = vmatprep.subr.bf16.mxu1 %v843_v0 }
  0xe6   :  { %765 = vmatpush3.bf16.msra.mxu1 %v827_v31 }
  0xe7   :  { %766 = vmatprep.subr.bf16.mxu1 %v843_v0 }
  0xea   :  { %767 = vmatpush3.bf16.msra.mxu1 %v828_v32 }
  0xeb   :  { %792 = vmatprep.subr.bf16.mxu1 %v843_v0 }
 0x18d   :  { %v174_v24 = vpop.f32.mrf.mxu1 }
 0x18e   :  { %v175_v25 = vadd.f32 %v652_v23, %v174_v24 }
 0x18f   :  { %v738_v26 = vpop.f32.mrf.mxu1 }
 0x190   :  { %v180_v27 = vmax.f32 %v175_v25, 0.0 }
 0x191   :  { %v177_v28 = vpop.f32.mrf.mxu1 }
 0x192   :  { %v190_v29 = vpack.c.bf16 %v180_v27, %v180_v27 }
 0x193   :  { %v739_v30 = vpop.f32.mrf.mxu1 }
 0x194   :  { %749 = vmatmul.mubr.msk.bf16.vlgmr.msra.gmra.mxu0 %vm221_vm3, %v190_v29 }
 0x195   :  { %788 = vmatprep.mubr.msk.bf16.mxu0 %vm844_vm0, %v843_v0  ;;  %773 = vmatpush3.bf16.msra.mxu0 %v829_v33 }
 0x196   :  { %774 = vmatprep.subr.bf16.mxu0 %v843_v0 }
 0x199   :  { %775 = vmatpush3.bf16.msra.mxu0 %v830_v34 }
 0x19a   :  { %776 = vmatprep.subr.bf16.mxu0 %v843_v0 }
 0x19d   :  { %777 = vmatpush3.bf16.msra.mxu0 %v831_v35 }
 0x19e   :  { %778 = vmatprep.subr.bf16.mxu0 %v843_v0 }
 0x1a1   :  { %779 = vmatpush3.bf16.msra.mxu0 %v832_v36 }
 0x1a2   :  { %780 = vmatprep.subr.bf16.mxu0 %v843_v0 }
 0x1a5   :  { %781 = vmatpush3.bf16.msra.mxu0 %v833_v37 }
 0x1a6   :  { %782 = vmatprep.subr.bf16.mxu0 %v843_v0 }
 0x1a9   :  { %783 = vmatpush3.bf16.msra.mxu0 %v834_v38 }
 0x1aa   :  { %784 = vmatprep.subr.bf16.mxu0 %v843_v0 }
 0x1ad   :  { %785 = vmatpush3.bf16.msra.mxu0 %v835_v47 }
 0x1ae   :  { %786 = vmatprep.subr.bf16.mxu0 %v843_v0 }
 0x1b1   :  { %787 = vmatpush3.bf16.msra.mxu0 %v836_v48 }
 0x1b2   :  { %804 = vmatprep.subr.bf16.mxu0 %v843_v0 }
 0x254   :  { %v259_v40 = vpop.f32.mrf.mxu0 }
 0x255   :  { %v260_v41 = vadd.f32 %v656_v39, %v259_v40 }
 0x256   :  { %v750_v42 = vpop.f32.mrf.mxu0 }
 0x257   :  { %v265_v43 = vmax.f32 %v260_v41, 0.0 }
 0x258   :  { %v262_v44 = vpop.f32.mrf.mxu0 }
 0x259   :  { %v283_v45 = vpack.c.bf16 %v265_v43, %v265_v43 }
 0x25a   :  { %v751_v46 = vpop.f32.mrf.mxu0 }
 0x25b   :  { %769 = vmatmul.mubr.bf16.vlgmr.msra.gmra.mxu1 %v283_v45 }
 0x25c   :  { %800 = vmatprep.mubr.msk.bf16.mxu1 %vm844_vm0, %v843_v0  ;;  %793 = vmatpush3.bf16.msra.mxu1 %v837_v49 }
 0x25d   :  { %794 = vmatprep.subr.bf16.mxu1 %v843_v0 }
 0x260   :  { %795 = vmatpush3.bf16.msra.mxu1 %v838_v50 }
 0x261   :  { %796 = vmatprep.subr.bf16.mxu1 %v843_v0 }
 0x264   :  { %797 = vmatpush3.bf16.msra.mxu1 %v839_v59 }
 0x265   :  { %798 = vmatprep.subr.bf16.mxu1 %v843_v0 }
 0x268   :  { %799 = vmatpush3.bf16.msra.mxu1 %v840_v60 }
 0x31b   :  { %v372_v52 = vpop.f32.mrf.mxu1 }
 0x31c   :  { %v373_v53 = vadd.f32 %v662_v51, %v372_v52 }
 0x31d   :  { %v770_v54 = vpop.f32.mrf.mxu1 }
 0x31e   :  { %v378_v55 = vmax.f32 %v373_v53, 0.0 }
 0x31f   :  { %v375_v56 = vpop.f32.mrf.mxu1 }
 0x320   :  { %v396_v57 = vpack.c.bf16 %v378_v55, %v378_v55 }
 0x321   :  { %v771_v58 = vpop.f32.mrf.mxu1 }
 0x322   :  { %789 = vmatmul.mubr.bf16.vlgmr.msra.gmra.mxu0 %v396_v57 }
 0x323   :  { %808 = vmatprep.mubr.msk.bf16.mxu0 %vm844_vm0, %v843_v0  ;;  %805 = vmatpush3.bf16.msra.mxu0 %v841_v61 }
 0x324   :  { %806 = vmatprep.subr.bf16.mxu0 %v843_v0  ;;  %v680_v0 = vld [vmem:[%s1099_s12] ss:$0 sm:$0xff] }
 0x327   :  { %807 = vmatpush3.bf16.msra.mxu0 %v842_v7 }
 0x3e2   :  { %v485_v63 = vpop.f32.mrf.mxu0 }
 0x3e3   :  { %v486_v1 = vadd.f32 %v671_v62, %v485_v63 }
 0x3e4   :  { %v790_v2 = vpop.f32.mrf.mxu0 }
 0x3e5   :  { %v491_v3 = vmax.f32 %v486_v1, 0.0 }
 0x3e6   :  { %v488_v4 = vpop.f32.mrf.mxu0 }
 0x3e7   :  { %v501_v5 = vpack.c.bf16 %v491_v3, %v491_v3 }
 0x3e8   :  { %v791_v6 = vpop.f32.mrf.mxu0 }
 0x3e9   :  { %801 = vmatmul.mubr.msk.bf16.vlgmr.msra.gmra.mxu1 %vm221_vm3, %v501_v5 }
 0x4a9   :  { %v569_v8 = vpop.f32.mrf.mxu1 }
 0x4aa   :  { %v570_v9 = vadd.f32 %v680_v0, %v569_v8 }
 0x4ab   :  { %v802_v10 = vpop.f32.mrf.mxu1 }
 0x4ac   :  { %v575_v11 = vmax.f32 %v570_v9, 0.0 }
 0x4ad   :  { %v572_v12 = vpop.f32.mrf.mxu1 }
 0x4ae   :  { %v581_v13 = vpack.c.bf16 %v575_v11, %v575_v11 }
 0x4af   :  { %v803_v14 = vpop.f32.mrf.mxu1 }
 0x4b0   :  { %809 = vmatmul.mubr.msk.bf16.vlgmr.msra.gmra.mxu0 %vm136_vm2, %v581_v13 }
 0x570   :  { %v637_v16 = vpop.f32.mrf.mxu0 }
 0x571   :  { %v638_v17 = vadd.f32 %v686_v15, %v637_v16 }
 0x572   :  { %v810_v18 = vpop.f32.mrf.mxu0 }
 0x573   :  { %644 = vst.msk [vmem:[%s1101_s15] sm:$0xff] %vm643_vm4, %v638_v17 }
 0x574   :  { %v640_v19 = vpop.f32.mrf.mxu0 }
 0x576   :  { %v811_v20 = vpop.f32.mrf.mxu0 }

</bundles_post_ra>
